<compile_context>
chip_gen: v7x
topology: tpu7x:2x2x1
jax: 0.10.0
libtpu: 0.0.40
codegen_flags: <defaults>
</compile_context>

<pallas_src>
import math
from functools import partial

import jax
import jax.numpy as jnp
from jax.experimental import pallas as pl
from jax.experimental.pallas import tpu as pltpu

LANE = 128


def _round_up(n, m):
    return ((n + m - 1) // m) * m


def _pick_tm(B, tm_max):
    """Batch tile size: multiple of 8, >=2 grid steps whenever B > 8 (so the
    'parallel' batch axis can shard across v7x's two TensorCores), capped so
    double-buffered VMEM stays well under the default scoped limit."""
    if B <= 8:
        return B  # full-dim block (legal: block dim == array dim)
    return min(tm_max, _round_up(-(-B // 2), 8))


# ---------------------------------------------------------------------------
# Kernels
# ---------------------------------------------------------------------------
def _fused_probe_kernel(x_ref, z_ref, wf_ref, bf_ref, wp_ref, bp_ref,
                        of_ref, op_ref):
    """Two independent Linear layers in one kernel body.

    Weights are pre-transposed and lane-padded to [in_dim, 128]; biases are
    [1, 128].  Only the first n_classes columns of each accumulator are
    stored (narrow, unpadded HBM output)."""
    nc = of_ref.shape[-1]
    acc_f = (jnp.dot(x_ref[...], wf_ref[...],
                     preferred_element_type=jnp.float32) + bf_ref[...])
    of_ref[...] = acc_f[:, :nc].astype(of_ref.dtype)
    acc_p = (jnp.dot(z_ref[...], wp_ref[...],
                     preferred_element_type=jnp.float32) + bp_ref[...])
    op_ref[...] = acc_p[:, :nc].astype(op_ref.dtype)


def _linear_kernel(x_ref, wt_ref, b_ref, o_ref):
    """Single Linear head: o = (x @ W.T + b)[:, :n_classes]."""
    nc = o_ref.shape[-1]
    acc = (jnp.dot(x_ref[...], wt_ref[...],
                   preferred_element_type=jnp.float32) + b_ref[...])
    o_ref[...] = acc[:, :nc].astype(o_ref.dtype)


# ---------------------------------------------------------------------------
# Wrappers (jitted: shapes static, dispatch overhead removed)
# ---------------------------------------------------------------------------
@partial(jax.jit, static_argnames=("n_classes", "tm_max"))
def fused_pair_linear(x, zplus, wt_f, b_f, wt_p, b_p, *, n_classes,
                      tm_max=4096):
    """Both probe heads in one pallas_call.  Returns ((B, nc), (B, nc))."""
    B, in_f = x.shape
    _, in_p = zplus.shape
    nc_pad = wt_f.shape[1]
    tm = _pick_tm(B, tm_max)
    grid = (pl.cdiv(B, tm),)

    flops = 2 * B * (in_f + in_p) * n_classes
    bytes_accessed = 4 * (B * (in_f + in_p + 2 * n_classes)
                          + (in_f + in_p + 2) * nc_pad)

    return pl.pallas_call(
        _fused_probe_kernel,
        out_shape=(jax.ShapeDtypeStruct((B, n_classes), x.dtype),
                   jax.ShapeDtypeStruct((B, n_classes), zplus.dtype)),
        grid=grid,
        in_specs=[
            pl.BlockSpec((tm, in_f), lambda i: (i, 0)),       # x tile
            pl.BlockSpec((tm, in_p), lambda i: (i, 0)),       # zplus tile
            pl.BlockSpec((in_f, nc_pad), lambda i: (0, 0)),   # Wf.T (resident)
            pl.BlockSpec((1, nc_pad), lambda i: (0, 0)),      # bf   (resident)
            pl.BlockSpec((in_p, nc_pad), lambda i: (0, 0)),   # Wp.T (resident)
            pl.BlockSpec((1, nc_pad), lambda i: (0, 0)),      # bp   (resident)
        ],
        out_specs=(pl.BlockSpec((tm, n_classes), lambda i: (i, 0)),
                   pl.BlockSpec((tm, n_classes), lambda i: (i, 0))),
        compiler_params=pltpu.CompilerParams(
            dimension_semantics=("parallel",)),
        cost_estimate=pl.CostEstimate(flops=flops, transcendentals=0,
                                      bytes_accessed=bytes_accessed),
    )(x, zplus, wt_f, b_f, wt_p, b_p)


@partial(jax.jit, static_argnames=("n_classes", "tm_max"))
def padded_linear(x, wt_pad, b_pad, *, n_classes, tm_max=4096):
    """Single probe head (forward_feat / forward_pred)."""
    B, in_dim = x.shape
    nc_pad = wt_pad.shape[1]
    tm = _pick_tm(B, tm_max)
    grid = (pl.cdiv(B, tm),)

    flops = 2 * B * in_dim * n_classes
    bytes_accessed = 4 * (B * (in_dim + n_classes) + (in_dim + 1) * nc_pad)

    return pl.pallas_call(
        _linear_kernel,
        out_shape=jax.ShapeDtypeStruct((B, n_classes), x.dtype),
        grid=grid,
        in_specs=[
            pl.BlockSpec((tm, in_dim), lambda i: (i, 0)),
            pl.BlockSpec((in_dim, nc_pad), lambda i: (0, 0)),
            pl.BlockSpec((1, nc_pad), lambda i: (0, 0)),
        ],
        out_specs=pl.BlockSpec((tm, n_classes), lambda i: (i, 0)),
        compiler_params=pltpu.CompilerParams(
            dimension_semantics=("parallel",)),
        cost_estimate=pl.CostEstimate(flops=flops, transcendentals=0,
                                      bytes_accessed=bytes_accessed),
    )(x, wt_pad, b_pad)


# ---------------------------------------------------------------------------
# Module port
# ---------------------------------------------------------------------------
def _init_linear_params(key, in_dim, out_dim, nc_pad):
    """torch.nn.Linear default init (uniform +/- 1/sqrt(in_dim)).

    Returns (raw (w, b) in PyTorch layout, padded (W.T, b) in kernel layout).
    Transpose + lane padding done ONCE here, never per forward."""
    kw, kb = jax.random.split(key)
    bound = 1.0 / math.sqrt(in_dim)
    w = jax.random.uniform(kw, (out_dim, in_dim), jnp.float32, -bound, bound)
    b = jax.random.uniform(kb, (out_dim,), jnp.float32, -bound, bound)
    wt_pad = jnp.zeros((in_dim, nc_pad), jnp.float32).at[:, :out_dim].set(w.T)
    b_pad = jnp.zeros((1, nc_pad), jnp.float32).at[0, :out_dim].set(b)
    return (w, b), (wt_pad, b_pad)


class OfflinePairProbePallas:
    """JAX/Pallas port of OfflinePairProbe (net='linear')."""

    def __init__(self, feature_dim, predictor_dim, n_classes,
                 modes=("none",), ctxt_list=(0, 126), key=None):
        self.feature_dim = feature_dim
        self.predictor_dim = predictor_dim
        self.n_classes = n_classes
        self.nc_pad = _round_up(max(n_classes, 1), LANE)   # in-VMEM lane pad
        key = jax.random.PRNGKey(0) if key is None else key

        self.networks = {}          # raw PyTorch-layout params (reference)
        self.networks_padded = {}   # kernel-layout params (W.T, lane-padded)
        for mode in modes:
            key, kf = jax.random.split(key)
            (fw, fb), (fwt, fbp) = _init_linear_params(
                kf, feature_dim * 2, n_classes, self.nc_pad)
            pred_raw, pred_pad = {}, {}
            for ctxt_len in ctxt_list:
                key, kp = jax.random.split(key)
                (pw, pb), (pwt, pbp) = _init_linear_params(
                    kp, predictor_dim * 2, n_classes, self.nc_pad)
                pred_raw[str(ctxt_len)] = (pw, pb)
                pred_pad[str(ctxt_len)] = (pwt, pbp)
            self.networks[mode] = {
                "feature_clf": (fw, fb),
                "predictor_zplus_clf": pred_raw,
            }
            self.networks_padded[mode] = {
                "feature_clf": (fwt, fbp),
                "predictor_zplus_clf": pred_pad,
            }

    def forward(self, x, zplus, mode="none", ctxt=0):
        fwt, fbp = self.networks_padded[mode]["feature_clf"]
        pwt, pbp = self.networks_padded[mode]["predictor_zplus_clf"][str(ctxt)]
        return fused_pair_linear(x, zplus, fwt, fbp, pwt, pbp,
                                 n_classes=self.n_classes)

    def forward_feat(self, x, mode="none"):
        fwt, fbp = self.networks_padded[mode]["feature_clf"]
        return padded_linear(x, fwt, fbp, n_classes=self.n_classes)

    def forward_pred(self, zplus, mode="none", ctxt=0):
        pwt, pbp = self.networks_padded[mode]["predictor_zplus_clf"][str(ctxt)]
        return padded_linear(zplus, pwt, pbp, n_classes=self.n_classes)


# ---------------------------------------------------------------------------
# Self-check
# ---------------------------------------------------------------------------
if __name__ == "__main__":
    feature_dim = 32
    predictor_dim = 16
    n_classes = 10

    key = jax.random.PRNGKey(0)
    kx, kz, kparams, kx2, kz2 = jax.random.split(key, 5)

    probe = OfflinePairProbePallas(feature_dim, predictor_dim, n_classes,
                                   modes=("none",), ctxt_list=(0, 126),
                                   key=kparams)
    fw, fb = probe.networks["none"]["feature_clf"]
    pw0, pb0 = probe.networks["none"]["predictor_zplus_clf"]["0"]
    pw1, pb1 = probe.networks["none"]["predictor_zplus_clf"]["126"]

    # --- small batch (single grid step) ------------------------------------
    B = 8
    x = jax.random.normal(kx, (B, feature_dim * 2), jnp.float32)
    zplus = jax.random.normal(kz, (B, predictor_dim * 2), jnp.float32)

    feat_logits, pred_logits = probe.forward(x, zplus, mode="none", ctxt=0)
    feat_only = probe.forward_feat(x, mode="none")
    pred_only = probe.forward_pred(zplus, mode="none", ctxt=126)
    jax.block_until_ready((feat_logits, pred_logits, feat_only, pred_only))

    ref_feat = x @ fw.T + fb
    ref_pred0 = zplus @ pw0.T + pb0
    ref_pred1 = zplus @ pw1.T + pb1

    assert feat_logits.shape == (B, n_classes)
    assert pred_logits.shape == (B, n_classes)
    assert jnp.allclose(feat_logits, ref_feat, atol=1e-5, rtol=1e-5)
    assert jnp.allclose(pred_logits, ref_pred0, atol=1e-5, rtol=1e-5)
    assert jnp.allclose(feat_only, ref_feat, atol=1e-5, rtol=1e-5)
    assert jnp.allclose(pred_only, ref_pred1, atol=1e-5, rtol=1e-5)

    # --- multi-tile batch (grid > 1, exercises the megacore split path) ----
    B2 = 40
    x2 = jax.random.normal(kx2, (B2, feature_dim * 2), jnp.float32)
    z2 = jax.random.normal(kz2, (B2, predictor_dim * 2), jnp.float32)
    f2, p2 = probe.forward(x2, z2, mode="none", ctxt=126)
    jax.block_until_ready((f2, p2))
    assert f2.shape == (B2, n_classes)
    assert jnp.allclose(f2, x2 @ fw.T + fb, atol=1e-5, rtol=1e-5)
    assert jnp.allclose(p2, z2 @ pw1.T + pb1, atol=1e-5, rtol=1e-5)

    print("KERNEL_OK")
</pallas_src>

<mosaic_0001>
module attributes {stable_mosaic.version = 11 : i64} {
  func.func @_fused_probe_kernel(%arg0: i32, %arg1: memref<8x64xf32, #tpu.memory_space<vmem>>, %arg2: memref<8x32xf32, #tpu.memory_space<vmem>>, %arg3: memref<64x128xf32, #tpu.memory_space<vmem>>, %arg4: memref<1x128xf32, #tpu.memory_space<vmem>>, %arg5: memref<32x128xf32, #tpu.memory_space<vmem>>, %arg6: memref<1x128xf32, #tpu.memory_space<vmem>>, %arg7: memref<8x10xf32, #tpu.memory_space<vmem>>, %arg8: memref<8x10xf32, #tpu.memory_space<vmem>>) attributes {dimension_semantics = [#tpu.dimension_semantics<parallel>], iteration_bounds = array<i64: 1>, scalar_prefetch = 0 : i64, scratch_operands = 0 : i64, tpu.core_type = #tpu.core_type<tc>, window_params = [{transform_indices = @transform_0, window_bounds = array<i64: 8, 64>}, {transform_indices = @transform_1, window_bounds = array<i64: 8, 32>}, {pipeline_mode = #tpu.pipeline_mode<synchronous>, transform_indices = @transform_2, window_bounds = array<i64: 64, 128>}, {pipeline_mode = #tpu.pipeline_mode<synchronous>, transform_indices = @transform_3, window_bounds = array<i64: 1, 128>}, {pipeline_mode = #tpu.pipeline_mode<synchronous>, transform_indices = @transform_4, window_bounds = array<i64: 32, 128>}, {pipeline_mode = #tpu.pipeline_mode<synchronous>, transform_indices = @transform_5, window_bounds = array<i64: 1, 128>}, {transform_indices = @transform_6, window_bounds = array<i64: 8, 10>}, {transform_indices = @transform_7, window_bounds = array<i64: 8, 10>}]} {
    %c0 = arith.constant 0 : index
    %c0_0 = arith.constant 0 : index
    %0 = vector.load %arg1[%c0, %c0_0] : memref<8x64xf32, #tpu.memory_space<vmem>>, vector<8x64xf32>
    %c0_1 = arith.constant 0 : index
    %c0_2 = arith.constant 0 : index
    %1 = vector.load %arg3[%c0_1, %c0_2] : memref<64x128xf32, #tpu.memory_space<vmem>>, vector<64x128xf32>
    %cst = arith.constant dense<0.000000e+00> : vector<8x128xf32>
    %2 = tpu.matmul %0, %1, %cst {dimension_numbers = #tpu.dot_dimension_numbers<[1], [0], [0], [1], [0, 0, 1, 1], [], []>} : vector<8x64xf32>, vector<64x128xf32>, vector<8x128xf32> -> vector<8x128xf32>
    %c0_3 = arith.constant 0 : index
    %c0_4 = arith.constant 0 : index
    %3 = vector.load %arg4[%c0_3, %c0_4] : memref<1x128xf32, #tpu.memory_space<vmem>>, vector<1x128xf32>
    %4 = vector.broadcast %3 : vector<1x128xf32> to vector<8x128xf32>
    %5 = arith.addf %2, %4 : vector<8x128xf32>
    %6 = vector.extract_strided_slice %5 {offsets = [0, 0], sizes = [8, 10], strides = [1, 1]} : vector<8x128xf32> to vector<8x10xf32>
    %c0_5 = arith.constant 0 : index
    %c0_6 = arith.constant 0 : index
    %7 = vector.load %arg7[%c0_5, %c0_6] : memref<8x10xf32, #tpu.memory_space<vmem>>, vector<8x10xf32>
    tpu.vector_store %arg7[%c0_5, %c0_6], %6 {strides = array<i32>} : memref<8x10xf32, #tpu.memory_space<vmem>>, vector<8x10xf32>,
    %c0_7 = arith.constant 0 : index
    %c0_8 = arith.constant 0 : index
    %8 = vector.load %arg2[%c0_7, %c0_8] : memref<8x32xf32, #tpu.memory_space<vmem>>, vector<8x32xf32>
    %c0_9 = arith.constant 0 : index
    %c0_10 = arith.constant 0 : index
    %9 = vector.load %arg5[%c0_9, %c0_10] : memref<32x128xf32, #tpu.memory_space<vmem>>, vector<32x128xf32>
    %cst_11 = arith.constant dense<0.000000e+00> : vector<8x128xf32>
    %10 = tpu.matmul %8, %9, %cst_11 {dimension_numbers = #tpu.dot_dimension_numbers<[1], [0], [0], [1], [0, 0, 1, 1], [], []>} : vector<8x32xf32>, vector<32x128xf32>, vector<8x128xf32> -> vector<8x128xf32>
    %c0_12 = arith.constant 0 : index
    %c0_13 = arith.constant 0 : index
    %11 = vector.load %arg6[%c0_12, %c0_13] : memref<1x128xf32, #tpu.memory_space<vmem>>, vector<1x128xf32>
    %12 = vector.broadcast %11 : vector<1x128xf32> to vector<8x128xf32>
    %13 = arith.addf %10, %12 : vector<8x128xf32>
    %14 = vector.extract_strided_slice %13 {offsets = [0, 0], sizes = [8, 10], strides = [1, 1]} : vector<8x128xf32> to vector<8x10xf32>
    %c0_14 = arith.constant 0 : index
    %c0_15 = arith.constant 0 : index
    %15 = vector.load %arg8[%c0_14, %c0_15] : memref<8x10xf32, #tpu.memory_space<vmem>>, vector<8x10xf32>
    tpu.vector_store %arg8[%c0_14, %c0_15], %14 {strides = array<i32>} : memref<8x10xf32, #tpu.memory_space<vmem>>, vector<8x10xf32>,
    return
  }
  func.func @transform_0(%arg0: i32) -> (i32, i32) {
    %c0_i32 = arith.constant 0 : i32
    %c0_i32_0 = arith.constant 0 : i32
    return %arg0, %c0_i32 : i32, i32
  }
  func.func @transform_1(%arg0: i32) -> (i32, i32) {
    %c0_i32 = arith.constant 0 : i32
    %c0_i32_0 = arith.constant 0 : i32
    return %arg0, %c0_i32 : i32, i32
  }
  func.func @transform_2(%arg0: i32) -> (i32, i32) {
    %c0_i32 = arith.constant 0 : i32
    %c0_i32_0 = arith.constant 0 : i32
    %c0_i32_1 = arith.constant 0 : i32
    return %c0_i32, %c0_i32_0 : i32, i32
  }
  func.func @transform_3(%arg0: i32) -> (i32, i32) {
    %c0_i32 = arith.constant 0 : i32
    %c0_i32_0 = arith.constant 0 : i32
    %c0_i32_1 = arith.constant 0 : i32
    return %c0_i32, %c0_i32_0 : i32, i32
  }
  func.func @transform_4(%arg0: i32) -> (i32, i32) {
    %c0_i32 = arith.constant 0 : i32
    %c0_i32_0 = arith.constant 0 : i32
    %c0_i32_1 = arith.constant 0 : i32
    return %c0_i32, %c0_i32_0 : i32, i32
  }
  func.func @transform_5(%arg0: i32) -> (i32, i32) {
    %c0_i32 = arith.constant 0 : i32
    %c0_i32_0 = arith.constant 0 : i32
    %c0_i32_1 = arith.constant 0 : i32
    return %c0_i32, %c0_i32_0 : i32, i32
  }
  func.func @transform_6(%arg0: i32) -> (i32, i32) {
    %c0_i32 = arith.constant 0 : i32
    %c0_i32_0 = arith.constant 0 : i32
    return %arg0, %c0_i32 : i32, i32
  }
  func.func @transform_7(%arg0: i32) -> (i32, i32) {
    %c0_i32 = arith.constant 0 : i32
    %c0_i32_0 = arith.constant 0 : i32
    return %arg0, %c0_i32 : i32, i32
  }
}

</mosaic_0001>

<bundles_post_ra>
// kernel: fused_pair_linear.1
= control target key start
LH: loop header
LB: loop body
LE: loop exit
PB: predicated region body
PF: predicated region fallthrough
CT: control target
= control target key end

     0   :  { %13 = vsyncpa [#allocation3], 0  ;;  %s638_s0 = inlined_call_operand.hbm [shape: f32[8,64], index: 0, kind: input, shape index: {}]   ;;  %s639_s1 = inlined_call_operand.hbm [shape: f32[8,32], index: 1, kind: input, shape index: {}]   ;;  %s640_s2 = inlined_call_operand.hbm [shape: f32[64,128], index: 2, kind: input, shape index: {}]   ;;  %s641_s3 = inlined_call_operand.vmem [shape: f32[1,128], index: 3, kind: input, shape index: {}]   ;;  %s642_s4 = inlined_call_operand.hbm [shape: f32[32,128], index: 4, kind: input, shape index: {}]   ;;  %s643_s5 = inlined_call_operand.vmem [shape: f32[1,128], index: 5, kind: input, shape index: {}]   ;;  %s644_s6 = inlined_call_operand.hbm [shape: f32[8,10], index: 6, kind: output, shape index: {0}]   ;;  %s645_s7 = inlined_call_operand.hbm [shape: f32[8,10], index: 7, kind: output, shape index: {1}]  }
   0x1   :  { %14 = vsyncpa [#allocation6], 0 }
   0x2   :  { %15 = vsyncpa [#allocation9], 0 }
   0x3   :  { %16 = vsyncpa [#allocation4], 0 }
   0x4   :  { %17 = vsyncpa [#allocation12], 0  ;;  %s507_s24 = smov [#allocation5]   ;;  %s508_s26 = smov [#allocation2]  }
   0x5   :  { %s34_s25 = sshll.u32 %s507_s24, 4  ;;  %s24_s27 = sshll.u32 %s508_s26, 4  ;;  %s35_s25 = int_to_ptr.vmem [resolvable:$true] %s34_s25  ;;  %s25_s27 = int_to_ptr.vmem [resolvable:$true] %s24_s27 }
   0x6   :  { %s365_s30 = scalar_lea.hbm %s639_s1, 128 }
   0x7   :  { %p366_p0 = scmp.ne.s32.totalorder %s639_s1, %s365_s30  ;;  %p369_p1 = scmp.lt.u32.totalorder %s365_s30, %s639_s1 }
   0x9   :  { %p371_p2 = pnand %p369_p1, %p366_p0 }
   0xb   :  { %374 = shalt.err (!%p371_p2)
}
   0xc   :  { %s375_s12 = scalar_lea.vmem %s35_s25, 128  ;;  %p380_p4 = scmp.lt.s32.totalorder %s35_s25, %s35_s25 }
   0xd   :  { %p376_p3 = scmp.ne.s32.totalorder %s35_s25, %s375_s12  ;;  %p381_p5 = scmp.lt.s32.totalorder %s375_s12, %s375_s12 }
   0xf   :  { %p382_p6 = por %p381_p5, %p380_p4 }
  0x11   :  { %p383_p7 = pnand %p382_p6, %p376_p3 }
  0x13   :  { %386 = shalt.err (!%p383_p7)
}
  0x14   :  { %37 = dma.hbm_to_vmem [thread:$0]  %s639_s1, 128, %s35_s25, [#allocation6]  }
  0x15   :  { %s387_s17 = scalar_lea.hbm %s638_s0, 128 }
  0x16   :  { %p388_p8 = scmp.ne.s32.totalorder %s638_s0, %s387_s17  ;;  %p391_p9 = scmp.lt.u32.totalorder %s387_s17, %s638_s0 }
  0x18   :  { %p393_p10 = pnand %p391_p9, %p388_p8 }
  0x1a   :  { %396 = shalt.err (!%p393_p10)
}
  0x1b   :  { %s397_s22 = scalar_lea.vmem %s25_s27, 128  ;;  %p402_p12 = scmp.lt.s32.totalorder %s25_s27, %s25_s27 }
  0x1c   :  { %p398_p11 = scmp.ne.s32.totalorder %s25_s27, %s397_s22  ;;  %p403_p13 = scmp.lt.s32.totalorder %s397_s22, %s397_s22 }
  0x1e   :  { %p404_p0 = por %p403_p13, %p402_p12 }
  0x20   :  { %p405_p1 = pnand %p404_p0, %p398_p11 }
  0x22   :  { %408 = shalt.err (!%p405_p1)
}
  0x23   :  { %27 = dma.hbm_to_vmem [thread:$0]  %s638_s0, 128, %s25_s27, [#allocation3]  }
  0x24   :  { %s509_s24 = smov [#allocation7]   ;;  %s409_s29 = scalar_lea.hbm %s640_s2, 1024 }
  0x25   :  { %s43_s25 = sshll.u32 %s509_s24, 4  ;;  %p410_p2 = scmp.ne.s32.totalorder %s640_s2, %s409_s29  ;;  %s44_s25 = int_to_ptr.vmem [resolvable:$true] %s43_s25 }
  0x26   :  { %p413_p3 = scmp.lt.u32.totalorder %s409_s29, %s640_s2 }
  0x28   :  { %p415_p4 = pnand %p413_p3, %p410_p2 }
  0x2a   :  { %418 = shalt.err (!%p415_p4)
}
  0x2b   :  { %s419_s11 = scalar_lea.vmem %s44_s25, 1024  ;;  %p424_p6 = scmp.lt.s32.totalorder %s44_s25, %s44_s25 }
  0x2c   :  { %p420_p5 = scmp.ne.s32.totalorder %s44_s25, %s419_s11  ;;  %p425_p7 = scmp.lt.s32.totalorder %s419_s11, %s419_s11 }
  0x2e   :  { %p426_p8 = por %p425_p7, %p424_p6 }
  0x30   :  { %p427_p9 = pnand %p426_p8, %p420_p5 }
  0x32   :  { %430 = shalt.err (!%p427_p9)
}
  0x33   :  { %s510_s0 = smov 128   ;;  %s511_s27 = smov 8  }
  0x34   :  { %49 = dma.hbm_to_vmem [thread:$0]  %s640_s2, 1024, %s44_s25, [#allocation6], %s510_s0, %s510_s0, %s511_s27  }
  0x35   :  { %s512_s14 = smov [#allocation8]   ;;  %s431_s18 = scalar_lea.hbm %s642_s4, 512 }
  0x36   :  { %s57_s15 = sshll.u32 %s512_s14, 4  ;;  %p432_p10 = scmp.ne.s32.totalorder %s642_s4, %s431_s18  ;;  %s58_s15 = int_to_ptr.vmem [resolvable:$true] %s57_s15 }
  0x37   :  { %p435_p11 = scmp.lt.u32.totalorder %s431_s18, %s642_s4 }
  0x39   :  { %p437_p12 = pnand %p435_p11, %p432_p10 }
  0x3b   :  { %440 = shalt.err (!%p437_p12)
}
  0x3c   :  { %s441_s1 = scalar_lea.vmem %s58_s15, 512  ;;  %p446_p0 = scmp.lt.s32.totalorder %s58_s15, %s58_s15 }
  0x3d   :  { %p442_p13 = scmp.ne.s32.totalorder %s58_s15, %s441_s1  ;;  %p447_p1 = scmp.lt.s32.totalorder %s441_s1, %s441_s1 }
  0x3f   :  { %p448_p2 = por %p447_p1, %p446_p0 }
  0x41   :  { %p449_p3 = pnand %p448_p2, %p442_p13 }
  0x43   :  { %452 = shalt.err (!%p449_p3)
}
  0x44   :  { %63 = dma.hbm_to_vmem [thread:$0]  %s642_s4, 512, %s58_s15, [#allocation9], %s510_s0, %s510_s0, %s511_s27  }
  0x45   :  { %497 = dma.done.wait [#allocation3], 128  }
  0x46   :  { %498 = vsyncadd [#allocation3], 4294967168 }
  0x47   :  { %499 = dma.done.wait [#allocation6], 1152  }
  0x48   :  { %500 = vsyncadd [#allocation6], 4294966144 }
  0x49   :  { %501 = dma.done.wait [#allocation9], 512  }
  0x4a   :  { %502 = vsyncadd [#allocation9], 4294966784  ;;  %v513_v0 = vmov 0.0|0.0   ;;  %vm514_vm0 = vmmov 0   ;;  %v515_v1 = vmov 0.0   ;;  %v79_v2 = vld [vmem:[#allocation7] sm:$0xff] }
  0x4b   :  { %336 = vmatprep.subr.bf16.mxu0 %v513_v0  ;;  %348 = vmatprep.subr.bf16.mxu1 %v513_v0  ;;  %v80_v3 = vld [vmem:[#allocation7 + $0x8] sm:$0xff]  ;;  %v81_v4 = vld [vmem:[#allocation7 + $0x10] sm:$0xff]  ;;  %v82_v6 = vld [vmem:[#allocation7 + $0x18] sm:$0xff]  ;;  %vm182_vm1 = vcmask 261120   ;;  %vm94_vm2 = vcmask 523264   ;;  %s516_s25 = smov [#allocation11]  }
  0x4c   :  { %333 = vmatprep.mubr.msk.f32.mxu1 %vm514_vm0, %v515_v1  ;;  %322 = vmatprep.mubr.msk.f32.mxu0 %vm514_vm0, %v515_v1  ;;  %v337_v5 = vpack.c.bf16 %v80_v3, %v79_v2  ;;  %v171_v7 = vld [vmem:[#allocation8] sm:$0xff]  ;;  %v172_v8 = vld [vmem:[#allocation8 + $0x8] sm:$0xff]  ;;  %v173_v10 = vld [vmem:[#allocation8 + $0x10] sm:$0xff]  ;;  %v340_v11 = vpack.c.bf16 %v82_v6, %v81_v4  ;;  %s273_s26 = sshll.u32 %s516_s25, 4  ;;  %vm168_vm3 = vcmask 80896   ;;  %s274_s26 = int_to_ptr.vmem [resolvable:$true] %s273_s26 }
  0x4d   :  { %v349_v9 = vpack.c.bf16 %v172_v8, %v171_v7  ;;  %v174_v12 = vld [vmem:[#allocation8 + $0x18] sm:$0xff]  ;;  %v83_v13 = vld [vmem:[#allocation7 + $0x20] sm:$0xff]  ;;  %v84_v14 = vld [vmem:[#allocation7 + $0x28] sm:$0xff]  ;;  %s453_s28 = scalar_lea.vmem %s274_s26, 128  ;;  %p458_p5 = scmp.lt.s32.totalorder %s274_s26, %s274_s26 }
  0x4e   :  { %338 = vmatpush3.bf16.msra.mxu0 %v337_v5  ;;  %v352_v15 = vpack.c.bf16 %v174_v12, %v173_v10  ;;  %v343_v16 = vpack.c.bf16 %v84_v14, %v83_v13  ;;  %v85_v17 = vld [vmem:[#allocation7 + $0x30] sm:$0xff]  ;;  %v86_v18 = vld [vmem:[#allocation7 + $0x38] sm:$0xff]  ;;  %p454_p4 = scmp.ne.s32.totalorder %s274_s26, %s453_s28  ;;  %p459_p6 = scmp.lt.s32.totalorder %s453_s28, %s453_s28 }
  0x4f   :  { %339 = vmatprep.subr.bf16.mxu0 %v513_v0  ;;  %350 = vmatpush3.bf16.msra.mxu1 %v349_v9  ;;  %v170_v19 = vld [vmem:[#allocation5] sm:$0xff]  ;;  %v346_v20 = vpack.c.bf16 %v86_v18, %v85_v17  ;;  %v78_v21 = vld [vmem:[#allocation2] sm:$0xff] }
  0x50   :  { %351 = vmatprep.subr.bf16.mxu1 %v513_v0  ;;  %v290_v22 = vld [vmem:[%s643_s5] ss:$0 sm:$0xff]  ;;  %p460_p7 = por %p459_p6, %p458_p5 }
  0x52   :  { %341 = vmatpush3.bf16.msra.mxu0 %v340_v11  ;;  %p461_p8 = pnand %p460_p7, %p454_p4 }
  0x53   :  { %342 = vmatprep.subr.bf16.mxu0 %v513_v0  ;;  %353 = vmatpush3.bf16.msra.mxu1 %v352_v15 }
  0x56   :  { %344 = vmatpush3.bf16.msra.mxu0 %v343_v16  ;;  %334 = vmatmul.mubr.msk.f32.vlgmr.msra.gmra.mrb[0].mxu1 %vm182_vm1, %v170_v19 }
  0x57   :  { %345 = vmatprep.subr.bf16.mxu0 %v513_v0 }
  0x5a   :  { %347 = vmatpush3.bf16.msra.mxu0 %v346_v20 }
  0x5d   :  { %323 = vmatmul.mubr.msk.f32.vlgmr.msra.gmra.mrb[0].mxu0 %vm94_vm2, %v78_v21 }
 0x129   :  { %v252_v23 = vpop.f32.mrb[0].mxu1 }
 0x12a   :  { %v253_v24 = vadd.f32 %v290_v22, %v252_v23  ;;  %v335_v25 = vpop.f32.mrb[1].mxu1 }
 0x12c   :  { %256 = vst.msk [vmem:[#allocation11] sm:$0xff] %vm168_vm3, %v253_v24 }
 0x12d   :  { %464 = shalt.err (!%p461_p8)
}
 0x12e   :  { %s465_s5 = scalar_lea.hbm %s645_s7, 128 }
 0x12f   :  { %p466_p9 = scmp.ne.s32.totalorder %s645_s7, %s465_s5  ;;  %p469_p10 = scmp.lt.u32.totalorder %s465_s5, %s645_s7 }
 0x131   :  { %p471_p11 = pnand %p469_p10, %p466_p9 }
 0x133   :  { %474 = shalt.err (!%p471_p11)
}
 0x134   :  { %276 = dma.vmem_to_hbm [thread:$0]  %s274_s26, 128, %s645_s7, [#allocation12]   ;;  %v288_v26 = vld [vmem:[%s641_s3] ss:$0 sm:$0xff]  ;;  %v164_v27 = vpop.f32.mrb[0].mxu0 }
 0x135   :  { %s517_s14 = smov [#allocation10]   ;;  %v165_v28 = vadd.f32 %v288_v26, %v164_v27  ;;  %v324_v29 = vpop.f32.mrb[1].mxu0 }
 0x136   :  { %s263_s15 = sshll.u32 %s517_s14, 4  ;;  %s264_s15 = int_to_ptr.vmem [resolvable:$true] %s263_s15 }
 0x137   :  { %169 = vst.msk [vmem:[#allocation10] sm:$0xff] %vm168_vm3, %v165_v28  ;;  %s475_s16 = scalar_lea.vmem %s264_s15, 128  ;;  %p480_p13 = scmp.lt.s32.totalorder %s264_s15, %s264_s15 }
 0x138   :  { %p476_p12 = scmp.ne.s32.totalorder %s264_s15, %s475_s16  ;;  %p481_p0 = scmp.lt.s32.totalorder %s475_s16, %s475_s16 }
 0x13a   :  { %p482_p1 = por %p481_p0, %p480_p13 }
 0x13c   :  { %p483_p2 = pnand %p482_p1, %p476_p12 }
 0x13e   :  { %486 = shalt.err (!%p483_p2)
}
 0x13f   :  { %s487_s18 = scalar_lea.hbm %s644_s6, 128 }
 0x140   :  { %p488_p3 = scmp.ne.s32.totalorder %s644_s6, %s487_s18  ;;  %p491_p4 = scmp.lt.u32.totalorder %s487_s18, %s644_s6 }
 0x142   :  { %p493_p5 = pnand %p491_p4, %p488_p3 }
 0x144   :  { %496 = shalt.err (!%p493_p5)
}
 0x145   :  { %266 = dma.vmem_to_hbm [thread:$0]  %s264_s15, 128, %s644_s6, [#allocation4]  }
 0x146   :  { %503 = dma.done.wait [#allocation4], 128  }
 0x147   :  { %504 = vsyncadd [#allocation4], 4294967168 }
 0x148   :  { %505 = dma.done.wait [#allocation12], 128  }
 0x149   :  { %506 = vsyncadd [#allocation12], 4294967168 }
 0x14a   :  { %283 = vsyncpa [#allocation3], 1 }
 0x14b   :  { %284 = vsyncpa [#allocation6], 1 }
 0x14c   :  { %285 = vsyncpa [#allocation9], 1 }
 0x14d   :  { %286 = vsyncpa [#allocation4], 1 }
 0x14e   :  { %287 = vsyncpa [#allocation12], 1 }

</bundles_post_ra>
